<compile_context>
chip_gen: v7x
topology: tpu7x:2x2x1
jax: 0.10.0
libtpu: 0.0.40
codegen_flags: <defaults>
</compile_context>

<pallas_src>
import functools

import jax
import jax.numpy as jnp
from jax.experimental import pallas as pl
from jax.experimental.pallas import tpu as pltpu


# --------------------------------------------------------------------------
# helpers
# --------------------------------------------------------------------------
def _round_up(x, m):
    return (x + m - 1) // m * m


def _pick_tile(n_pad, cap):
    """Largest multiple of 128 that divides n_pad (itself a multiple of 128)
    and is <= cap.  Guarantees the grid tiles cover the padded extent."""
    best = 128
    t = 128
    limit = min(cap, n_pad)
    while t <= limit:
        if n_pad % t == 0:
            best = t
        t += 128
    return best


def _vmem_limit(block_bytes, accum_bytes=0):
    # Each pipelined block is double-buffered; 2x headroom on top, clamped so
    # the budget also fits v7x's 64 MiB physical VMEM.
    need = 2 * sum(block_bytes) + accum_bytes
    return int(min(max(2 * need, 8 * 2**20), 64 * 2**20))


def _glorot(key, shape):
    fan_out, fan_in = shape
    limit = jnp.sqrt(6.0 / (fan_in + fan_out))
    return jax.random.uniform(key, shape, jnp.float32, -limit, limit)


# --------------------------------------------------------------------------
# kernel 1: z = d_inv_sqrt * (x @ W^T)   (row-tiled, bf16 MXU, f32 accum)
# --------------------------------------------------------------------------
def _linear_kernel(x_ref, w_ref, d_ref, z_ref, *, need_norm):
    z = jnp.dot(x_ref[...], w_ref[...], preferred_element_type=jnp.float32)
    if need_norm:
        z = z * d_ref[...]                      # (tm, 1) row scale, f32
    z_ref[...] = z.astype(z_ref.dtype)


# --------------------------------------------------------------------------
# kernel 2: out = d_inv_sqrt * (adj @ z) + bias   (row x K tiled accumulation)
# --------------------------------------------------------------------------
def _prop_kernel(adj_ref, z_ref, d_ref, b_ref, out_ref, acc_ref, *,
                 need_norm, use_bias):
    k = pl.program_id(1)

    @pl.when(k == 0)
    def _():
        acc_ref[...] = jnp.zeros_like(acc_ref)

    acc_ref[...] += jnp.dot(adj_ref[...], z_ref[...],
                            preferred_element_type=jnp.float32)

    @pl.when(k == pl.num_programs(1) - 1)
    def _():
        out = acc_ref[...]
        if need_norm:
            out = out * d_ref[...]              # (tm, 1) row scale
        if use_bias:
            out = out + b_ref[...]              # (1, Hp) epilogue-only bias
        out_ref[...] = out.astype(out_ref.dtype)


# --------------------------------------------------------------------------
# DenseGCN forward
# --------------------------------------------------------------------------
@functools.partial(jax.jit, static_argnames=("need_norm", "compute_dtype",
                                             "row_tile", "k_tile"))
def dense_gcn(adj, x, weight, bias=None, *, need_norm=False,
              compute_dtype=jnp.bfloat16, row_tile=256, k_tile=512):
    """Pallas forward of DenseGCN.

    adj:    (N, N) f32        x: (N, F_in) f32
    weight: (H, F_in) f32 (nn.Linear layout)    bias: (H,) f32 or None
    """
    N, f_in = x.shape
    h = weight.shape[0]
    use_bias = bias is not None

    # ---- pad to lane/sublane-aligned shapes (sliced off at the end) ----
    n_p = _round_up(N, 128)
    tm = _pick_tile(n_p, row_tile)   # exact divisor of n_p
    tk = _pick_tile(n_p, k_tile)     # exact divisor of n_p
    f_p = _round_up(f_in, 128)
    h_p = _round_up(h, 128)          # lane-dense output (full-lane vst)

    adj_p = jnp.pad(adj.astype(jnp.float32), ((0, n_p - N), (0, n_p - N)))
    x_p = jnp.pad(x.astype(jnp.float32), ((0, n_p - N), (0, f_p - f_in)))
    w_t = jnp.pad(weight.astype(jnp.float32).T,
                  ((0, f_p - f_in), (0, h_p - h)))            # (Fp, Hp)
    b_p = jnp.zeros((1, h_p), jnp.float32)
    if use_bias:
        b_p = b_p.at[0, :h].set(bias.astype(jnp.float32))

    if need_norm:
        # D^-1/2 from row degrees: cheap O(N^2) XLA reduction; folded into z
        # and the output instead of rescaling the full adjacency.
        deg = jnp.sum(adj_p, axis=1, keepdims=True)
        d = jax.lax.rsqrt(deg)
        d = jnp.where(jnp.isinf(d), jnp.zeros_like(d), d)     # deg == 0 -> 0
    else:
        d = jnp.ones((n_p, 1), jnp.float32)

    cdt = jnp.dtype(compute_dtype)
    bpe = cdt.itemsize
    adj_c = adj_p.astype(cdt)
    x_c = x_p.astype(cdt)
    w_c = w_t.astype(cdt)

    n_row = n_p // tm
    n_k = n_p // tk

    # ---- kernel 1: z = d * (x @ W^T), stored in compute dtype ----
    lin = functools.partial(_linear_kernel, need_norm=need_norm)
    z = pl.pallas_call(
        lin,
        out_shape=jax.ShapeDtypeStruct((n_p, h_p), cdt),
        grid_spec=pltpu.PrefetchScalarGridSpec(
            num_scalar_prefetch=0,
            grid=(n_row,),
            in_specs=[
                pl.BlockSpec((tm, f_p), lambda i: (i, 0)),
                pl.BlockSpec((f_p, h_p), lambda i: (0, 0)),
                pl.BlockSpec((tm, 1), lambda i: (i, 0)),
            ],
            out_specs=pl.BlockSpec((tm, h_p), lambda i: (i, 0)),
        ),
        compiler_params=pltpu.CompilerParams(
            dimension_semantics=("parallel",),
            vmem_limit_bytes=_vmem_limit(
                [tm * f_p * bpe, f_p * h_p * bpe, tm * 4, tm * h_p * bpe])),
    )(x_c, w_c, d)

    # ---- kernel 2: out = d * (adj @ z) + bias, tiled accumulation ----
    prop = functools.partial(_prop_kernel, need_norm=need_norm,
                             use_bias=use_bias)
    out_p = pl.pallas_call(
        prop,
        out_shape=jax.ShapeDtypeStruct((n_p, h_p), jnp.float32),
        grid_spec=pltpu.PrefetchScalarGridSpec(
            num_scalar_prefetch=0,
            grid=(n_row, n_k),
            in_specs=[
                pl.BlockSpec((tm, tk), lambda i, k: (i, k)),
                pl.BlockSpec((tk, h_p), lambda i, k: (k, 0)),
                pl.BlockSpec((tm, 1), lambda i, k: (i, 0)),
                pl.BlockSpec((1, h_p), lambda i, k: (0, 0)),
            ],
            out_specs=pl.BlockSpec((tm, h_p), lambda i, k: (i, 0)),
            scratch_shapes=[pltpu.VMEM((tm, h_p), jnp.float32)],
        ),
        compiler_params=pltpu.CompilerParams(
            dimension_semantics=("parallel", "arbitrary"),
            vmem_limit_bytes=_vmem_limit(
                [tm * tk * bpe, tk * h_p * bpe, tm * 4, h_p * 4,
                 tm * h_p * 4],
                accum_bytes=tm * h_p * 4)),
    )(adj_c, z, d, b_p)

    return out_p[:N, :h]


# --------------------------------------------------------------------------
# GConv forward (GCN encoder, dense-adjacency path)
# --------------------------------------------------------------------------
def gconv_forward(adj, x, weights, biases, bn_gamma, bn_beta, *,
                  compute_dtype=jnp.bfloat16, eps=1e-5):
    """Stacked DenseGCN layers (need_norm=False, as GConv builds them); shared
    BatchNorm1d(2*hidden) + ReLU between layers, ReLU after the last layer.
    BatchNorm/ReLU are tiny O(N*C) ops and are left to XLA, not Pallas."""
    # TODO(synk): encoder_type='GIN' (DenseGINConv) and the sparse edge_index
    # path of GConv.forward are not implemented here.
    n_layers = len(weights)
    z = x
    for i in range(n_layers):
        z = dense_gcn(adj, z, weights[i], biases[i], need_norm=False,
                      compute_dtype=compute_dtype)
        if i != n_layers - 1:
            # nn.BatchNorm1d in training mode: batch statistics, biased var.
            mean = jnp.mean(z, axis=0, keepdims=True)
            var = jnp.var(z, axis=0, keepdims=True)
            z = (z - mean) * jax.lax.rsqrt(var + eps) * bn_gamma + bn_beta
        z = jax.nn.relu(z)
    return z


# --------------------------------------------------------------------------
# pure-JAX references
# --------------------------------------------------------------------------
def _reference_dense_gcn(adj, x, weight, bias, need_norm):
    hp = jax.lax.Precision.HIGHEST
    z = jnp.dot(x, weight.T, precision=hp)
    if need_norm:
        d = jnp.power(jnp.sum(adj, axis=1), -0.5)
        d = jnp.where(jnp.isinf(d), 0.0, d)
        adj = d[:, None] * adj * d[None, :]
    out = jnp.dot(adj, z, precision=hp)
    return out + bias if bias is not None else out


def _reference_gconv(adj, x, weights, biases, gamma, beta, eps=1e-5):
    z = x
    for i in range(len(weights)):
        z = _reference_dense_gcn(adj, z, weights[i], biases[i], False)
        if i != len(weights) - 1:
            mean = jnp.mean(z, axis=0, keepdims=True)
            var = jnp.var(z, axis=0, keepdims=True)
            z = (z - mean) * jax.lax.rsqrt(var + eps) * gamma + beta
        z = jax.nn.relu(z)
    return z


if __name__ == "__main__":
    key = jax.random.PRNGKey(0)
    k_adj, k_x, k_w, k_b, k_layers = jax.random.split(key, 5)

    N, input_dim, hidden_dim = 8, 16, 32

    # Symmetric binary adjacency with self loops.
    a = (jax.random.uniform(k_adj, (N, N)) > 0.6).astype(jnp.float32)
    adj = jnp.clip(a + a.T + jnp.eye(N, dtype=jnp.float32), 0.0, 1.0)
    x = jax.random.normal(k_x, (N, input_dim), jnp.float32)

    # ---- DenseGCN unit checks (both need_norm modes) ----
    weight = _glorot(k_w, (hidden_dim, input_dim))
    bias = 0.1 * jax.random.normal(k_b, (hidden_dim,), jnp.float32)

    for need_norm in (False, True):
        ref = _reference_dense_gcn(adj, x, weight, bias, need_norm)

        out_f32 = jax.block_until_ready(
            dense_gcn(adj, x, weight, bias, need_norm=need_norm,
                      compute_dtype=jnp.float32))
        assert out_f32.shape == (N, hidden_dim)
        assert jnp.allclose(out_f32, ref, atol=1e-4, rtol=1e-4), (
            f"f32 mismatch (need_norm={need_norm})")

    # bf16 MXU path (looser tolerance).
    ref_b = _reference_dense_gcn(adj, x, weight, bias, False)
    out_bf16 = jax.block_until_ready(
        dense_gcn(adj, x, weight, bias, need_norm=False,
                  compute_dtype=jnp.bfloat16))
    assert out_bf16.shape == (N, hidden_dim)
    assert jnp.allclose(out_bf16, ref_b, atol=5e-2, rtol=5e-2), "bf16 mismatch"

    # ---- GConv stack (num_layers=3, hidden_dim=32, module init) ----
    num_layers = 3
    dims = [(2 * hidden_dim, input_dim),
            (2 * hidden_dim, 2 * hidden_dim),
            (hidden_dim, 2 * hidden_dim)]
    wkeys = jax.random.split(k_layers, num_layers)
    weights = [_glorot(wkeys[i], dims[i]) for i in range(num_layers)]
    biases = [jnp.zeros((dims[i][0],), jnp.float32) for i in range(num_layers)]
    bn_gamma = jnp.ones((2 * hidden_dim,), jnp.float32)
    bn_beta = jnp.zeros((2 * hidden_dim,), jnp.float32)

    ref_g = _reference_gconv(adj, x, weights, biases, bn_gamma, bn_beta)

    out_gbf = jax.block_until_ready(
        gconv_forward(adj, x, weights, biases, bn_gamma, bn_beta,
                      compute_dtype=jnp.bfloat16))
    assert out_gbf.shape == (N, hidden_dim)
    rel = (jnp.linalg.norm(out_gbf - ref_g) /
           jnp.maximum(jnp.linalg.norm(ref_g), 1e-6))
    assert rel < 0.15, f"GConv bf16 relative error too large: {rel}"

    print("KERNEL_OK")
</pallas_src>

<mosaic_0001>
module attributes {stable_mosaic.version = 11 : i64} {
  func.func @_linear_kernel(%arg0: i32, %arg1: memref<128x128xf32, #tpu.memory_space<vmem>>, %arg2: memref<128x128xf32, #tpu.memory_space<vmem>>, %arg3: memref<128x1xf32, #tpu.memory_space<vmem>>, %arg4: memref<128x128xf32, #tpu.memory_space<vmem>>) attributes {dimension_semantics = [#tpu.dimension_semantics<parallel>], iteration_bounds = array<i64: 1>, scalar_prefetch = 0 : i64, scratch_operands = 0 : i64, tpu.core_type = #tpu.core_type<tc>, window_params = [{transform_indices = @transform_0, window_bounds = array<i64: 128, 128>}, {pipeline_mode = #tpu.pipeline_mode<synchronous>, transform_indices = @transform_1, window_bounds = array<i64: 128, 128>}, {transform_indices = @transform_2, window_bounds = array<i64: 128, 1>}, {transform_indices = @transform_3, window_bounds = array<i64: 128, 128>}]} {
    %c0 = arith.constant 0 : index
    %c0_0 = arith.constant 0 : index
    %0 = vector.load %arg1[%c0, %c0_0] : memref<128x128xf32, #tpu.memory_space<vmem>>, vector<128x128xf32>
    %c0_1 = arith.constant 0 : index
    %c0_2 = arith.constant 0 : index
    %1 = vector.load %arg2[%c0_1, %c0_2] : memref<128x128xf32, #tpu.memory_space<vmem>>, vector<128x128xf32>
    %cst = arith.constant dense<0.000000e+00> : vector<128x128xf32>
    %2 = tpu.matmul %0, %1, %cst {dimension_numbers = #tpu.dot_dimension_numbers<[1], [0], [0], [1], [0, 0, 1, 1], [], []>} : vector<128x128xf32>, vector<128x128xf32>, vector<128x128xf32> -> vector<128x128xf32>
    %c0_3 = arith.constant 0 : index
    %c0_4 = arith.constant 0 : index
    %3 = vector.load %arg4[%c0_3, %c0_4] : memref<128x128xf32, #tpu.memory_space<vmem>>, vector<128x128xf32>
    tpu.vector_store %arg4[%c0_3, %c0_4], %2 {strides = array<i32>} : memref<128x128xf32, #tpu.memory_space<vmem>>, vector<128x128xf32>,
    return
  }
  func.func @transform_0(%arg0: i32) -> (i32, i32) {
    %c0_i32 = arith.constant 0 : i32
    %c0_i32_0 = arith.constant 0 : i32
    return %arg0, %c0_i32 : i32, i32
  }
  func.func @transform_1(%arg0: i32) -> (i32, i32) {
    %c0_i32 = arith.constant 0 : i32
    %c0_i32_0 = arith.constant 0 : i32
    %c0_i32_1 = arith.constant 0 : i32
    return %c0_i32, %c0_i32_0 : i32, i32
  }
  func.func @transform_2(%arg0: i32) -> (i32, i32) {
    %c0_i32 = arith.constant 0 : i32
    %c0_i32_0 = arith.constant 0 : i32
    return %arg0, %c0_i32 : i32, i32
  }
  func.func @transform_3(%arg0: i32) -> (i32, i32) {
    %c0_i32 = arith.constant 0 : i32
    %c0_i32_0 = arith.constant 0 : i32
    return %arg0, %c0_i32 : i32, i32
  }
}

module attributes {stable_mosaic.version = 11 : i64} {
  func.func @_prop_kernel(%arg0: i32, %arg1: i32, %arg2: memref<128x128xf32, #tpu.memory_space<vmem>>, %arg3: memref<128x128xf32, #tpu.memory_space<vmem>>, %arg4: memref<128x1xf32, #tpu.memory_space<vmem>>, %arg5: memref<1x128xf32, #tpu.memory_space<vmem>>, %arg6: memref<128x128xf32, #tpu.memory_space<vmem>>, %arg7: memref<128x128xf32, #tpu.memory_space<vmem>>) attributes {dimension_semantics = [#tpu.dimension_semantics<parallel>, #tpu.dimension_semantics<arbitrary>], iteration_bounds = array<i64: 1, 1>, scalar_prefetch = 0 : i64, scratch_operands = 1 : i64, tpu.core_type = #tpu.core_type<tc>, window_params = [{transform_indices = @transform_0, window_bounds = array<i64: 128, 128>}, {transform_indices = @transform_1, window_bounds = array<i64: 128, 128>}, {transform_indices = @transform_2, window_bounds = array<i64: 128, 1>}, {pipeline_mode = #tpu.pipeline_mode<synchronous>, transform_indices = @transform_3, window_bounds = array<i64: 1, 128>}, {transform_indices = @transform_4, window_bounds = array<i64: 128, 128>}]} {
    %c0_i32 = arith.constant 0 : i32
    %0 = arith.cmpi eq, %arg1, %c0_i32 : i32
    %1 = arith.extui %0 : i1 to i32
    %c0_i32_0 = arith.constant 0 : i32
    %2 = arith.cmpi ne, %1, %c0_i32_0 : i32
    scf.if %2 {
      %cst_10 = arith.constant 0.000000e+00 : f32
      %12 = vector.broadcast %cst_10 : f32 to vector<128x128xf32>
      %c0_11 = arith.constant 0 : index
      %c0_12 = arith.constant 0 : index
      %13 = vector.load %arg7[%c0_11, %c0_12] : memref<128x128xf32, #tpu.memory_space<vmem>>, vector<128x128xf32>
      tpu.vector_store %arg7[%c0_11, %c0_12], %12 {strides = array<i32>} : memref<128x128xf32, #tpu.memory_space<vmem>>, vector<128x128xf32>,
    } else {
    }
    %c0 = arith.constant 0 : index
    %c0_1 = arith.constant 0 : index
    %3 = vector.load %arg7[%c0, %c0_1] : memref<128x128xf32, #tpu.memory_space<vmem>>, vector<128x128xf32>
    %c0_2 = arith.constant 0 : index
    %c0_3 = arith.constant 0 : index
    %4 = vector.load %arg2[%c0_2, %c0_3] : memref<128x128xf32, #tpu.memory_space<vmem>>, vector<128x128xf32>
    %c0_4 = arith.constant 0 : index
    %c0_5 = arith.constant 0 : index
    %5 = vector.load %arg3[%c0_4, %c0_5] : memref<128x128xf32, #tpu.memory_space<vmem>>, vector<128x128xf32>
    %cst = arith.constant dense<0.000000e+00> : vector<128x128xf32>
    %6 = tpu.matmul %4, %5, %cst {dimension_numbers = #tpu.dot_dimension_numbers<[1], [0], [0], [1], [0, 0, 1, 1], [], []>} : vector<128x128xf32>, vector<128x128xf32>, vector<128x128xf32> -> vector<128x128xf32>
    %7 = arith.addf %3, %6 : vector<128x128xf32>
    %c0_6 = arith.constant 0 : index
    %c0_7 = arith.constant 0 : index
    %8 = vector.load %arg7[%c0_6, %c0_7] : memref<128x128xf32, #tpu.memory_space<vmem>>, vector<128x128xf32>
    tpu.vector_store %arg7[%c0_6, %c0_7], %7 {strides = array<i32>} : memref<128x128xf32, #tpu.memory_space<vmem>>, vector<128x128xf32>,
    %c0_i32_8 = arith.constant 0 : i32
    %9 = arith.cmpi eq, %arg1, %c0_i32_8 : i32
    %10 = arith.extui %9 : i1 to i32
    %c0_i32_9 = arith.constant 0 : i32
    %11 = arith.cmpi ne, %10, %c0_i32_9 : i32
    scf.if %11 {
      %c0_10 = arith.constant 0 : index
      %c0_11 = arith.constant 0 : index
      %12 = vector.load %arg7[%c0_10, %c0_11] : memref<128x128xf32, #tpu.memory_space<vmem>>, vector<128x128xf32>
      %c0_12 = arith.constant 0 : index
      %c0_13 = arith.constant 0 : index
      %13 = vector.load %arg5[%c0_12, %c0_13] : memref<1x128xf32, #tpu.memory_space<vmem>>, vector<1x128xf32>
      %14 = vector.broadcast %13 : vector<1x128xf32> to vector<128x128xf32>
      %15 = arith.addf %12, %14 : vector<128x128xf32>
      %c0_14 = arith.constant 0 : index
      %c0_15 = arith.constant 0 : index
      %16 = vector.load %arg6[%c0_14, %c0_15] : memref<128x128xf32, #tpu.memory_space<vmem>>, vector<128x128xf32>
      tpu.vector_store %arg6[%c0_14, %c0_15], %15 {strides = array<i32>} : memref<128x128xf32, #tpu.memory_space<vmem>>, vector<128x128xf32>,
    } else {
    }
    return
  }
  func.func @transform_0(%arg0: i32, %arg1: i32) -> (i32, i32) {
    %c0_i32 = arith.constant 0 : i32
    return %arg0, %arg1 : i32, i32
  }
  func.func @transform_1(%arg0: i32, %arg1: i32) -> (i32, i32) {
    %c0_i32 = arith.constant 0 : i32
    %c0_i32_0 = arith.constant 0 : i32
    return %arg1, %c0_i32 : i32, i32
  }
  func.func @transform_2(%arg0: i32, %arg1: i32) -> (i32, i32) {
    %c0_i32 = arith.constant 0 : i32
    %c0_i32_0 = arith.constant 0 : i32
    return %arg0, %c0_i32 : i32, i32
  }
  func.func @transform_3(%arg0: i32, %arg1: i32) -> (i32, i32) {
    %c0_i32 = arith.constant 0 : i32
    %c0_i32_0 = arith.constant 0 : i32
    %c0_i32_1 = arith.constant 0 : i32
    return %c0_i32, %c0_i32_0 : i32, i32
  }
  func.func @transform_4(%arg0: i32, %arg1: i32) -> (i32, i32) {
    %c0_i32 = arith.constant 0 : i32
    %c0_i32_0 = arith.constant 0 : i32
    return %arg0, %c0_i32 : i32, i32
  }
}

</mosaic_0001>

<bundles_post_ra>
// kernel: dense_gcn.2
= control target key start
LH: loop header
LB: loop body
LE: loop exit
PB: predicated region body
PF: predicated region fallthrough
CT: control target
= control target key end

     0   :  { %s511_s1 = inlined_call_operand.vmem [shape: f32[128,128], index: 1, kind: input, shape index: {}]   ;;  %s512_s2 = inlined_call_operand.vmem [shape: f32[128,1], index: 2, kind: input, shape index: {}]   ;;  %s513_s0 = inlined_call_operand.vmem [shape: f32[128,128], index: 0, kind: input, shape index: {}]   ;;  %s514_s3 = inlined_call_operand.vmem [shape: f32[128,128], index: 3, kind: output, shape index: {}]  }
   0x1   :  { %v30_v0 = vld [vmem:[%s511_s1] sm:$0xff]  ;;  %v31_v1 = vld [vmem:[%s511_s1 + $0x8] sm:$0xff]  ;;  %v32_v2 = vld [vmem:[%s511_s1 + $0x10] sm:$0xff] }
   0x2   :  { %v299_v3 = vpack.c.bf16 %v31_v1, %v30_v0  ;;  %v33_v4 = vld [vmem:[%s511_s1 + $0x18] sm:$0xff]  ;;  %v34_v6 = vld [vmem:[%s511_s1 + $0x20] sm:$0xff]  ;;  %v35_v7 = vld [vmem:[%s511_s1 + $0x28] sm:$0xff] }
   0x3   :  { %v303_v5 = vpack.c.bf16 %v33_v4, %v32_v2  ;;  %v307_v8 = vpack.c.bf16 %v35_v7, %v34_v6  ;;  %v14_v9 = vld [vmem:[%s513_s0] sm:$0xff]  ;;  %v36_v11 = vld [vmem:[%s511_s1 + $0x30] sm:$0xff]  ;;  %v37_v12 = vld [vmem:[%s511_s1 + $0x38] sm:$0xff] }
   0x4   :  { %300 = vmatprep.subr.bf16.mxu0 %v299_v3  ;;  %331 = vmatprep.subr.bf16.mxu1 %v299_v3  ;;  %v22_v10 = vld [vmem:[%s513_s0 + $0x40] sm:$0xff]  ;;  %v311_v13 = vpack.c.bf16 %v37_v12, %v36_v11  ;;  %v39_v15 = vld [vmem:[%s511_s1 + $0x48] sm:$0xff]  ;;  %v40_v17 = vld [vmem:[%s511_s1 + $0x50] sm:$0xff] }
   0x5   :  { %302 = vmatpush3.bf16.msra.mxu0 %v299_v3  ;;  %339 = vmatpush3.bf16.msra.mxu1 %v299_v3  ;;  %v38_v14 = vld [vmem:[%s511_s1 + $0x40] sm:$0xff]  ;;  %v41_v18 = vld [vmem:[%s511_s1 + $0x58] sm:$0xff]  ;;  %v43_v21 = vld [vmem:[%s511_s1 + $0x68] sm:$0xff] }
   0x6   :  { %304 = vmatprep.subr.bf16.mxu0 %v303_v5  ;;  %332 = vmatprep.subr.bf16.mxu1 %v303_v5  ;;  %v315_v16 = vpack.c.bf16 %v39_v15, %v38_v14  ;;  %v319_v19 = vpack.c.bf16 %v41_v18, %v40_v17  ;;  %v42_v20 = vld [vmem:[%s511_s1 + $0x60] sm:$0xff]  ;;  %v44_v23 = vld [vmem:[%s511_s1 + $0x70] sm:$0xff]  ;;  %v45_v24 = vld [vmem:[%s511_s1 + $0x78] sm:$0xff] }
   0x7   :  { %275 = vmatprep.mubr.f32.mxu0 %v14_v9  ;;  %287 = vmatprep.mubr.f32.mxu1 %v22_v10  ;;  %v323_v22 = vpack.c.bf16 %v43_v21, %v42_v20  ;;  %v327_v25 = vpack.c.bf16 %v45_v24, %v44_v23  ;;  %v15_v26 = vld [vmem:[%s513_s0 + $0x8] sm:$0xff]  ;;  %v16_v28 = vld [vmem:[%s513_s0 + $0x10] sm:$0xff]  ;;  %v17_v30 = vld [vmem:[%s513_s0 + $0x18] sm:$0xff] }
   0x8   :  { %v23_v27 = vld [vmem:[%s513_s0 + $0x48] sm:$0xff]  ;;  %v24_v29 = vld [vmem:[%s513_s0 + $0x50] sm:$0xff]  ;;  %v25_v31 = vld [vmem:[%s513_s0 + $0x58] sm:$0xff] }
   0x9   :  { %306 = vmatpush3.bf16.msra.mxu0 %v303_v5  ;;  %340 = vmatpush3.bf16.msra.mxu1 %v303_v5  ;;  %v18_v32 = vld [vmem:[%s513_s0 + $0x20] sm:$0xff]  ;;  %v19_v34 = vld [vmem:[%s513_s0 + $0x28] sm:$0xff]  ;;  %v20_v36 = vld [vmem:[%s513_s0 + $0x30] sm:$0xff] }
   0xa   :  { %308 = vmatprep.subr.bf16.mxu0 %v307_v8  ;;  %333 = vmatprep.subr.bf16.mxu1 %v307_v8  ;;  %v26_v33 = vld [vmem:[%s513_s0 + $0x60] sm:$0xff]  ;;  %v27_v35 = vld [vmem:[%s513_s0 + $0x68] sm:$0xff]  ;;  %v28_v37 = vld [vmem:[%s513_s0 + $0x70] sm:$0xff] }
   0xb   :  { %v21_v38 = vld [vmem:[%s513_s0 + $0x38] sm:$0xff] }
   0xc   :  { %v29_v39 = vld [vmem:[%s513_s0 + $0x78] sm:$0xff] }
   0xd   :  { %310 = vmatpush3.bf16.msra.mxu0 %v307_v8  ;;  %341 = vmatpush3.bf16.msra.mxu1 %v307_v8 }
   0xe   :  { %312 = vmatprep.subr.bf16.mxu0 %v311_v13  ;;  %334 = vmatprep.subr.bf16.mxu1 %v311_v13 }
  0x11   :  { %314 = vmatpush3.bf16.msra.mxu0 %v311_v13  ;;  %342 = vmatpush3.bf16.msra.mxu1 %v311_v13 }
  0x12   :  { %316 = vmatprep.subr.bf16.mxu0 %v315_v16  ;;  %335 = vmatprep.subr.bf16.mxu1 %v315_v16 }
  0x15   :  { %318 = vmatpush3.bf16.msra.mxu0 %v315_v16  ;;  %343 = vmatpush3.bf16.msra.mxu1 %v315_v16 }
  0x16   :  { %320 = vmatprep.subr.bf16.mxu0 %v319_v19  ;;  %336 = vmatprep.subr.bf16.mxu1 %v319_v19 }
  0x19   :  { %322 = vmatpush3.bf16.msra.mxu0 %v319_v19  ;;  %344 = vmatpush3.bf16.msra.mxu1 %v319_v19 }
  0x1a   :  { %324 = vmatprep.subr.bf16.mxu0 %v323_v22  ;;  %337 = vmatprep.subr.bf16.mxu1 %v323_v22 }
  0x1d   :  { %326 = vmatpush3.bf16.msra.mxu0 %v323_v22  ;;  %345 = vmatpush3.bf16.msra.mxu1 %v323_v22 }
  0x1e   :  { %328 = vmatprep.subr.bf16.mxu0 %v327_v25  ;;  %338 = vmatprep.subr.bf16.mxu1 %v327_v25 }
  0x21   :  { %330 = vmatpush3.bf16.msra.mxu0 %v327_v25  ;;  %346 = vmatpush3.bf16.msra.mxu1 %v327_v25 }
  0x24   :  { %276 = vmatmul.mubr.f32.vlgmr.msra.gmra.mrb[0].mxu0 %v15_v26  ;;  %288 = vmatmul.mubr.f32.vlgmr.msra.gmra.mrb[0].mxu1 %v23_v27 }
  0x25   :  { %278 = vmatprep.mubr.f32.mxu0 %v16_v28  ;;  %290 = vmatprep.mubr.f32.mxu1 %v24_v29 }
  0x28   :  { %279 = vmatmul.mubr.f32.gmra.mrb[2].mxu0 %v17_v30  ;;  %291 = vmatmul.mubr.f32.gmra.mrb[2].mxu1 %v25_v31 }
  0x29   :  { %281 = vmatprep.mubr.f32.mxu0 %v18_v32  ;;  %293 = vmatprep.mubr.f32.mxu1 %v26_v33 }
  0x2c   :  { %282 = vmatmul.mubr.f32.gmra.mrb[4].mxu0 %v19_v34  ;;  %294 = vmatmul.mubr.f32.gmra.mrb[4].mxu1 %v27_v35 }
  0x2d   :  { %284 = vmatprep.mubr.f32.mxu0 %v20_v36  ;;  %296 = vmatprep.mubr.f32.mxu1 %v28_v37 }
  0x30   :  { %285 = vmatmul.mubr.f32.gmra.mrb[6].mxu0 %v21_v38  ;;  %297 = vmatmul.mubr.f32.gmra.mrb[6].mxu1 %v29_v39 }
  0xf7   :  { %v277_v40 = vpop.f32.mrb[0].mxu0  ;;  %v289_v41 = vpop.f32.mrb[0].mxu1 }
  0xf8   :  { %192 = vst [vmem:[%s514_s3 + $0x8] sm:$0xff] %v277_v40  ;;  %200 = vst [vmem:[%s514_s3 + $0x48] sm:$0xff] %v289_v41  ;;  %v112_v42 = vpop.f32.mrb[1].mxu0  ;;  %v152_v43 = vpop.f32.mrb[1].mxu1 }
  0xf9   :  { %191 = vst [vmem:[%s514_s3] sm:$0xff] %v112_v42  ;;  %199 = vst [vmem:[%s514_s3 + $0x40] sm:$0xff] %v152_v43 }
  0xfb   :  { %v280_v44 = vpop.f32.mrb[2].mxu0  ;;  %v292_v45 = vpop.f32.mrb[2].mxu1 }
  0xfc   :  { %194 = vst [vmem:[%s514_s3 + $0x18] sm:$0xff] %v280_v44  ;;  %202 = vst [vmem:[%s514_s3 + $0x58] sm:$0xff] %v292_v45  ;;  %v122_v46 = vpop.f32.mrb[3].mxu0  ;;  %v162_v47 = vpop.f32.mrb[3].mxu1 }
  0xfd   :  { %193 = vst [vmem:[%s514_s3 + $0x10] sm:$0xff] %v122_v46  ;;  %201 = vst [vmem:[%s514_s3 + $0x50] sm:$0xff] %v162_v47 }
  0xff   :  { %v283_v48 = vpop.f32.mrb[4].mxu0  ;;  %v295_v49 = vpop.f32.mrb[4].mxu1 }
 0x100   :  { %196 = vst [vmem:[%s514_s3 + $0x28] sm:$0xff] %v283_v48  ;;  %204 = vst [vmem:[%s514_s3 + $0x68] sm:$0xff] %v295_v49  ;;  %v132_v50 = vpop.f32.mrb[5].mxu0  ;;  %v172_v51 = vpop.f32.mrb[5].mxu1 }
 0x101   :  { %195 = vst [vmem:[%s514_s3 + $0x20] sm:$0xff] %v132_v50  ;;  %203 = vst [vmem:[%s514_s3 + $0x60] sm:$0xff] %v172_v51 }
 0x103   :  { %v286_v52 = vpop.f32.mrb[6].mxu0  ;;  %v298_v53 = vpop.f32.mrb[6].mxu1 }
 0x104   :  { %198 = vst [vmem:[%s514_s3 + $0x38] sm:$0xff] %v286_v52  ;;  %206 = vst [vmem:[%s514_s3 + $0x78] sm:$0xff] %v298_v53  ;;  %v142_v54 = vpop.f32.mrb[7].mxu0  ;;  %v182_v55 = vpop.f32.mrb[7].mxu1 }
 0x105   :  { %197 = vst [vmem:[%s514_s3 + $0x30] sm:$0xff] %v142_v54  ;;  %205 = vst [vmem:[%s514_s3 + $0x70] sm:$0xff] %v182_v55 }

// kernel: dense_gcn.3
= control target key start
LH: loop header
LB: loop body
LE: loop exit
PB: predicated region body
PF: predicated region fallthrough
CT: control target
= control target key end

     0   :  { %s633_s1 = inlined_call_operand.vmem [shape: f32[128,128], index: 1, kind: input, shape index: {}]   ;;  %s634_s2 = inlined_call_operand.vmem [shape: f32[128,1], index: 2, kind: input, shape index: {}]   ;;  %s635_s0 = inlined_call_operand.vmem [shape: f32[128,128], index: 0, kind: input, shape index: {}]   ;;  %s636_s3 = inlined_call_operand.vmem [shape: f32[1,128], index: 3, kind: input, shape index: {}]   ;;  %s637_s4 = inlined_call_operand.vmem [shape: f32[128,128], index: 4, kind: output, shape index: {}]  }
   0x1   :  { %v69_v0 = vld [vmem:[%s633_s1] sm:$0xff]  ;;  %v70_v1 = vld [vmem:[%s633_s1 + $0x8] sm:$0xff]  ;;  %v71_v2 = vld [vmem:[%s633_s1 + $0x10] sm:$0xff] }
   0x2   :  { %v413_v3 = vpack.c.bf16 %v70_v1, %v69_v0  ;;  %v72_v4 = vld [vmem:[%s633_s1 + $0x18] sm:$0xff]  ;;  %v73_v6 = vld [vmem:[%s633_s1 + $0x20] sm:$0xff]  ;;  %v74_v7 = vld [vmem:[%s633_s1 + $0x28] sm:$0xff] }
   0x3   :  { %v417_v5 = vpack.c.bf16 %v72_v4, %v71_v2  ;;  %v421_v8 = vpack.c.bf16 %v74_v7, %v73_v6  ;;  %v53_v9 = vld [vmem:[%s635_s0] sm:$0xff]  ;;  %v75_v11 = vld [vmem:[%s633_s1 + $0x30] sm:$0xff]  ;;  %v76_v12 = vld [vmem:[%s633_s1 + $0x38] sm:$0xff] }
   0x4   :  { %414 = vmatprep.subr.bf16.mxu0 %v413_v3  ;;  %445 = vmatprep.subr.bf16.mxu1 %v413_v3  ;;  %v61_v10 = vld [vmem:[%s635_s0 + $0x40] sm:$0xff]  ;;  %v425_v13 = vpack.c.bf16 %v76_v12, %v75_v11  ;;  %v78_v15 = vld [vmem:[%s633_s1 + $0x48] sm:$0xff]  ;;  %v79_v17 = vld [vmem:[%s633_s1 + $0x50] sm:$0xff] }
   0x5   :  { %416 = vmatpush3.bf16.msra.mxu0 %v413_v3  ;;  %453 = vmatpush3.bf16.msra.mxu1 %v413_v3  ;;  %v77_v14 = vld [vmem:[%s633_s1 + $0x40] sm:$0xff]  ;;  %v80_v18 = vld [vmem:[%s633_s1 + $0x58] sm:$0xff]  ;;  %v82_v21 = vld [vmem:[%s633_s1 + $0x68] sm:$0xff] }
   0x6   :  { %418 = vmatprep.subr.bf16.mxu0 %v417_v5  ;;  %446 = vmatprep.subr.bf16.mxu1 %v417_v5  ;;  %v429_v16 = vpack.c.bf16 %v78_v15, %v77_v14  ;;  %v433_v19 = vpack.c.bf16 %v80_v18, %v79_v17  ;;  %v81_v20 = vld [vmem:[%s633_s1 + $0x60] sm:$0xff]  ;;  %v83_v23 = vld [vmem:[%s633_s1 + $0x70] sm:$0xff]  ;;  %v84_v24 = vld [vmem:[%s633_s1 + $0x78] sm:$0xff] }
   0x7   :  { %389 = vmatprep.mubr.f32.mxu0 %v53_v9  ;;  %401 = vmatprep.mubr.f32.mxu1 %v61_v10  ;;  %v437_v22 = vpack.c.bf16 %v82_v21, %v81_v20  ;;  %v441_v25 = vpack.c.bf16 %v84_v24, %v83_v23  ;;  %v54_v26 = vld [vmem:[%s635_s0 + $0x8] sm:$0xff]  ;;  %v55_v28 = vld [vmem:[%s635_s0 + $0x10] sm:$0xff]  ;;  %v56_v30 = vld [vmem:[%s635_s0 + $0x18] sm:$0xff] }
   0x8   :  { %v62_v27 = vld [vmem:[%s635_s0 + $0x48] sm:$0xff]  ;;  %v63_v29 = vld [vmem:[%s635_s0 + $0x50] sm:$0xff]  ;;  %v64_v31 = vld [vmem:[%s635_s0 + $0x58] sm:$0xff] }
   0x9   :  { %420 = vmatpush3.bf16.msra.mxu0 %v417_v5  ;;  %454 = vmatpush3.bf16.msra.mxu1 %v417_v5  ;;  %v57_v32 = vld [vmem:[%s635_s0 + $0x20] sm:$0xff]  ;;  %v58_v34 = vld [vmem:[%s635_s0 + $0x28] sm:$0xff]  ;;  %v59_v36 = vld [vmem:[%s635_s0 + $0x30] sm:$0xff] }
   0xa   :  { %422 = vmatprep.subr.bf16.mxu0 %v421_v8  ;;  %447 = vmatprep.subr.bf16.mxu1 %v421_v8  ;;  %v65_v33 = vld [vmem:[%s635_s0 + $0x60] sm:$0xff]  ;;  %v66_v35 = vld [vmem:[%s635_s0 + $0x68] sm:$0xff]  ;;  %v67_v37 = vld [vmem:[%s635_s0 + $0x70] sm:$0xff] }
   0xb   :  { %v60_v38 = vld [vmem:[%s635_s0 + $0x38] sm:$0xff]  ;;  %v324_v40 = vld [vmem:[%s636_s3] ss:$0 sm:$0xff] }
   0xc   :  { %v68_v39 = vld [vmem:[%s635_s0 + $0x78] sm:$0xff] }
   0xd   :  { %424 = vmatpush3.bf16.msra.mxu0 %v421_v8  ;;  %455 = vmatpush3.bf16.msra.mxu1 %v421_v8 }
   0xe   :  { %426 = vmatprep.subr.bf16.mxu0 %v425_v13  ;;  %448 = vmatprep.subr.bf16.mxu1 %v425_v13 }
  0x11   :  { %428 = vmatpush3.bf16.msra.mxu0 %v425_v13  ;;  %456 = vmatpush3.bf16.msra.mxu1 %v425_v13 }
  0x12   :  { %430 = vmatprep.subr.bf16.mxu0 %v429_v16  ;;  %449 = vmatprep.subr.bf16.mxu1 %v429_v16 }
  0x15   :  { %432 = vmatpush3.bf16.msra.mxu0 %v429_v16  ;;  %457 = vmatpush3.bf16.msra.mxu1 %v429_v16 }
  0x16   :  { %434 = vmatprep.subr.bf16.mxu0 %v433_v19  ;;  %450 = vmatprep.subr.bf16.mxu1 %v433_v19 }
  0x19   :  { %436 = vmatpush3.bf16.msra.mxu0 %v433_v19  ;;  %458 = vmatpush3.bf16.msra.mxu1 %v433_v19 }
  0x1a   :  { %438 = vmatprep.subr.bf16.mxu0 %v437_v22  ;;  %451 = vmatprep.subr.bf16.mxu1 %v437_v22 }
  0x1d   :  { %440 = vmatpush3.bf16.msra.mxu0 %v437_v22  ;;  %459 = vmatpush3.bf16.msra.mxu1 %v437_v22 }
  0x1e   :  { %442 = vmatprep.subr.bf16.mxu0 %v441_v25  ;;  %452 = vmatprep.subr.bf16.mxu1 %v441_v25 }
  0x21   :  { %444 = vmatpush3.bf16.msra.mxu0 %v441_v25  ;;  %460 = vmatpush3.bf16.msra.mxu1 %v441_v25 }
  0x24   :  { %390 = vmatmul.mubr.f32.vlgmr.msra.gmra.mrb[0].mxu0 %v54_v26  ;;  %402 = vmatmul.mubr.f32.vlgmr.msra.gmra.mrb[0].mxu1 %v62_v27 }
  0x25   :  { %392 = vmatprep.mubr.f32.mxu0 %v55_v28  ;;  %404 = vmatprep.mubr.f32.mxu1 %v63_v29 }
  0x28   :  { %393 = vmatmul.mubr.f32.gmra.mrb[2].mxu0 %v56_v30  ;;  %405 = vmatmul.mubr.f32.gmra.mrb[2].mxu1 %v64_v31 }
  0x29   :  { %395 = vmatprep.mubr.f32.mxu0 %v57_v32  ;;  %407 = vmatprep.mubr.f32.mxu1 %v65_v33 }
  0x2c   :  { %396 = vmatmul.mubr.f32.gmra.mrb[4].mxu0 %v58_v34  ;;  %408 = vmatmul.mubr.f32.gmra.mrb[4].mxu1 %v66_v35 }
  0x2d   :  { %398 = vmatprep.mubr.f32.mxu0 %v59_v36  ;;  %410 = vmatprep.mubr.f32.mxu1 %v67_v37 }
  0x30   :  { %399 = vmatmul.mubr.f32.gmra.mrb[6].mxu0 %v60_v38  ;;  %411 = vmatmul.mubr.f32.gmra.mrb[6].mxu1 %v68_v39 }
  0xf7   :  { %v391_v41 = vpop.f32.mrb[0].mxu0  ;;  %v403_v42 = vpop.f32.mrb[0].mxu1 }
  0xf8   :  { %v289_v43 = vadd.f32 %v391_v41, %v324_v40  ;;  %v297_v44 = vadd.f32 %v403_v42, %v324_v40  ;;  %v151_v45 = vpop.f32.mrb[1].mxu0  ;;  %v191_v46 = vpop.f32.mrb[1].mxu1 }
  0xf9   :  { %v288_v47 = vadd.f32 %v324_v40, %v151_v45  ;;  %v296_v48 = vadd.f32 %v324_v40, %v191_v46 }
  0xfa   :  { %305 = vst [vmem:[%s637_s4 + $0x8] sm:$0xff] %v289_v43  ;;  %313 = vst [vmem:[%s637_s4 + $0x48] sm:$0xff] %v297_v44 }
  0xfb   :  { %304 = vst [vmem:[%s637_s4] sm:$0xff] %v288_v47  ;;  %312 = vst [vmem:[%s637_s4 + $0x40] sm:$0xff] %v296_v48  ;;  %v394_v49 = vpop.f32.mrb[2].mxu0  ;;  %v406_v50 = vpop.f32.mrb[2].mxu1 }
  0xfc   :  { %v291_v51 = vadd.f32 %v394_v49, %v324_v40  ;;  %v299_v52 = vadd.f32 %v406_v50, %v324_v40  ;;  %v161_v53 = vpop.f32.mrb[3].mxu0  ;;  %v201_v54 = vpop.f32.mrb[3].mxu1 }
  0xfd   :  { %v290_v55 = vadd.f32 %v324_v40, %v161_v53  ;;  %v298_v56 = vadd.f32 %v324_v40, %v201_v54 }
  0xfe   :  { %307 = vst [vmem:[%s637_s4 + $0x18] sm:$0xff] %v291_v51  ;;  %315 = vst [vmem:[%s637_s4 + $0x58] sm:$0xff] %v299_v52 }
  0xff   :  { %306 = vst [vmem:[%s637_s4 + $0x10] sm:$0xff] %v290_v55  ;;  %314 = vst [vmem:[%s637_s4 + $0x50] sm:$0xff] %v298_v56  ;;  %v397_v57 = vpop.f32.mrb[4].mxu0  ;;  %v409_v58 = vpop.f32.mrb[4].mxu1 }
 0x100   :  { %v293_v59 = vadd.f32 %v397_v57, %v324_v40  ;;  %v301_v60 = vadd.f32 %v409_v58, %v324_v40  ;;  %v171_v61 = vpop.f32.mrb[5].mxu0  ;;  %v211_v62 = vpop.f32.mrb[5].mxu1 }
 0x101   :  { %v292_v63 = vadd.f32 %v324_v40, %v171_v61  ;;  %v300_v0 = vadd.f32 %v324_v40, %v211_v62 }
 0x102   :  { %309 = vst [vmem:[%s637_s4 + $0x28] sm:$0xff] %v293_v59  ;;  %317 = vst [vmem:[%s637_s4 + $0x68] sm:$0xff] %v301_v60 }
 0x103   :  { %308 = vst [vmem:[%s637_s4 + $0x20] sm:$0xff] %v292_v63  ;;  %316 = vst [vmem:[%s637_s4 + $0x60] sm:$0xff] %v300_v0  ;;  %v400_v1 = vpop.f32.mrb[6].mxu0  ;;  %v412_v2 = vpop.f32.mrb[6].mxu1 }
 0x104   :  { %v295_v3 = vadd.f32 %v400_v1, %v324_v40  ;;  %v303_v4 = vadd.f32 %v412_v2, %v324_v40  ;;  %v181_v5 = vpop.f32.mrb[7].mxu0  ;;  %v221_v6 = vpop.f32.mrb[7].mxu1 }
 0x105   :  { %v294_v7 = vadd.f32 %v324_v40, %v181_v5  ;;  %v302_v8 = vadd.f32 %v324_v40, %v221_v6 }
 0x106   :  { %311 = vst [vmem:[%s637_s4 + $0x38] sm:$0xff] %v295_v3  ;;  %319 = vst [vmem:[%s637_s4 + $0x78] sm:$0xff] %v303_v4 }
 0x107   :  { %310 = vst [vmem:[%s637_s4 + $0x30] sm:$0xff] %v294_v7  ;;  %318 = vst [vmem:[%s637_s4 + $0x70] sm:$0xff] %v302_v8 }

</bundles_post_ra>
